<compile_context>
chip_gen: v5e
topology: v5e:2x2
jax: 0.10.0
libtpu: 0.0.40
codegen_flags: <defaults>
</compile_context>

<pallas_src>
import jax
import jax.numpy as jnp
from jax.experimental import pallas as pl
from jax.experimental.pallas import tpu as pltpu

DIM = 768       # self.dim
HIDDEN = 100    # self.hidden

_LANE = 128
_SUBLANE = 8

# Conservative in-kernel bytes per (batch, seq, dim) token element:
#   bf16 input block x2 (double buffer) + f32 upcast + f32 broadcast-mask temp
#   + select result / slack. Honest accounting so the tile really fits VMEM.
_TOK_BYTES_PER_ELEM = 16


def _round_up(x, m):
    return ((x + m - 1) // m) * m


def _vmem_budget():
    """Per-generation VMEM sizing (v5e/v6e: 128 MiB, v7x: 64 MiB per TC)."""
    cap = 64 * 1024 * 1024  # safe fallback = smallest (v7x per-TC) VMEM
    try:
        info = pltpu.get_tpu_info()
        got = getattr(info, "vmem_capacity_bytes", None)
        if got:
            cap = int(got)
    except Exception:
        pass
    budget = min(int(cap * 0.45), 60 * 1024 * 1024)   # working set for pipelined tiles
    limit = min(int(cap * 0.75), 100 * 1024 * 1024)   # scoped VMEM limit for Mosaic
    limit = max(limit, 32 * 1024 * 1024)
    return budget, limit


def _pick_tiles(B, S, D, HP1, HP2, budget):
    """Choose (bm, sc): batch tile and per-grid-step sequence chunk."""
    # Fixed VMEM: bf16 weights + f32 biases (charged x2, conservatively double-buffered).
    fixed = 2 * (2 * (D * HP1 + HP1 * HP2) + 4 * (HP1 + HP2))
    avail = max(budget - fixed, 2 << 20)

    def bm_for(sc):
        per_row = (sc * D * _TOK_BYTES_PER_ELEM   # token chunk + in-kernel temps
                   + sc * 4 * 2                    # f32 mask chunk, double-buffered
                   + D * 4                         # f32 pooled-sum accumulator
                   + _LANE * 4                     # f32 count accumulator (lane-padded)
                   + HP2 * 4 * 2)                  # f32 output block, double-buffered
        return (avail // per_row) // _SUBLANE * _SUBLANE

    # Prefer holding the full sequence per step; fall back to 128-lane-aligned
    # sequence chunks (S reduction grid axis) when full-S squeezes bm too hard.
    candidates = [S]
    if S > 256:
        candidates += [c for c in (1024, 512, 256, 128) if c < S]
    best_bm, best_sc = 0, S
    for sc in candidates:
        if sc != S and sc % _LANE != 0:
            continue  # mask block lanes must be a 128-multiple (or the full S)
        bm = bm_for(sc)
        if sc == S and bm >= 128:
            return bm, sc            # full-S tile with a healthy batch tile
        if bm > best_bm:
            best_bm, best_sc = bm, sc
    if best_bm >= _SUBLANE:
        return best_bm, best_sc
    # Last resort: minimum tile (may exceed the soft budget; hard limit still applies).
    return _SUBLANE, (_LANE if S > _LANE else S)


def _pool_mlp_kernel(tok_ref, mask_ref, w1_ref, b1_ref, w2_ref, b2_ref, out_ref,
                     acc_ref, cnt_ref):
    # tok_ref:  (bm, sc, D)  bf16/f32 token-embedding chunk
    # mask_ref: (bm, sc)     f32 attention mask in {0, 1} (zero-padded along S)
    # w1_ref:   (D, HP1) bf16, b1_ref: (1, HP1) f32
    # w2_ref:   (HP1, HP2) bf16, b2_ref: (1, HP2) f32
    # out_ref:  (bm, HP2) f32 (lane-dense, unmasked stores)
    # acc_ref:  (bm, D) f32 pooled-sum scratch; cnt_ref: (bm, 1) f32 token counts
    k = pl.program_id(1)

    @pl.when(k == 0)
    def _init():
        acc_ref[...] = jnp.zeros_like(acc_ref)
        cnt_ref[...] = jnp.zeros_like(cnt_ref)

    mask = mask_ref[...]                                     # (bm, sc) f32
    tokf = tok_ref[...].astype(jnp.float32)                  # (bm, sc, D)
    maskf = jnp.broadcast_to(mask[:, :, None], tokf.shape)   # lane broadcast
    # select == tok * mask for a {0,1} mask, and also zeroes any undefined data
    # read from ragged (out-of-bounds) token blocks along B or S.
    masked = jnp.where(maskf > 0.0, tokf, 0.0)
    acc_ref[...] += jnp.sum(masked, axis=1)                  # f32 accumulation
    cnt_ref[...] += jnp.sum(mask, axis=1, keepdims=True)

    @pl.when(k == pl.num_programs(1) - 1)
    def _finalize():
        denom = jnp.maximum(cnt_ref[...], 1e-9)              # matches torch.clamp(min=1e-9)
        emb = acc_ref[...] * pl.reciprocal(denom, approx=True)   # EUP reciprocal (free slot)
        # MLP head on the MXU: bf16 operands, f32 accumulation.
        h = jnp.dot(emb.astype(w1_ref.dtype), w1_ref[...],
                    preferred_element_type=jnp.float32) + b1_ref[...]
        h = jnp.maximum(h, 0.0)
        out = jnp.dot(h.astype(w2_ref.dtype), w2_ref[...],
                      preferred_element_type=jnp.float32) + b2_ref[...]
        out_ref[...] = out.astype(out_ref.dtype)


def pool_and_project(token_embeddings, attention_mask, w1, b1, w2, b2,
                     *, block_b=None, block_s=None):
    """Masked mean pooling over S followed by Linear -> ReLU -> Linear.

    token_embeddings: (B, S, D); bf16 recommended (halves HBM traffic, kernel
    accumulates in f32). attention_mask: (B, S) in {0, 1}.
    """
    B, S, D = token_embeddings.shape
    H1 = w1.shape[1]
    H2 = w2.shape[1]
    HP1 = _round_up(H1, _LANE)   # pad hidden dims to 128 lanes: dense MXU tiles & stores
    HP2 = _round_up(H2, _LANE)
    tok_bytes = jnp.dtype(token_embeddings.dtype).itemsize

    budget, vmem_limit = _vmem_budget()
    bm, sc = _pick_tiles(B, S, D, HP1, HP2, budget)
    if block_b is not None:
        bm = max(_SUBLANE, _round_up(block_b, _SUBLANE))
    if block_s is not None:
        sc = block_s if block_s >= S else _round_up(block_s, _LANE)
    if B >= 16:
        # keep >= 2 batch tiles so the "parallel" axis can shard across 2 TCs (v7x)
        bm = min(bm, _round_up(pl.cdiv(B, 2), _SUBLANE))
    if bm >= B:
        bm = B               # single full-batch tile: full-dim blocks, no padding needed
    sc = min(sc, S)

    num_b = pl.cdiv(B, bm)
    num_s = pl.cdiv(S, sc)
    s_pad = num_s * sc

    # No padding / copying of the (B, S, D) token tensor: ragged batch / sequence
    # boundary blocks are handled by Pallas masked boundary tiles plus the
    # in-kernel mask select. Only the tiny (B, S) mask is zero-padded along S.
    mask = attention_mask.astype(jnp.float32)
    if s_pad != S:
        mask = jnp.pad(mask, ((0, 0), (0, s_pad - S)))

    # Weights in bf16 (native MXU on v6e/v7x, half the weight VMEM); biases in f32.
    w1_p = jnp.pad(w1.astype(jnp.bfloat16), ((0, 0), (0, HP1 - H1)))
    b1_p = jnp.pad(b1.astype(jnp.float32), ((0, HP1 - H1),)).reshape(1, HP1)
    w2_p = jnp.pad(w2.astype(jnp.bfloat16), ((0, HP1 - H1), (0, HP2 - H2)))
    b2_p = jnp.pad(b2.astype(jnp.float32), ((0, HP2 - H2),)).reshape(1, HP2)

    cost = pl.CostEstimate(
        flops=2 * B * S * D + 2 * B * (D * HP1 + HP1 * HP2),
        transcendentals=B,
        bytes_accessed=(B * S * D * tok_bytes + B * s_pad * 4
                        + 2 * (D * HP1 + HP1 * HP2) + 4 * (HP1 + HP2)
                        + B * HP2 * 4),
    )

    out = pl.pallas_call(
        _pool_mlp_kernel,
        out_shape=jax.ShapeDtypeStruct((B, HP2), jnp.float32),
        grid_spec=pltpu.PrefetchScalarGridSpec(
            num_scalar_prefetch=0,
            grid=(num_b, num_s),
            in_specs=[
                pl.BlockSpec((bm, sc, D), lambda i, k: (i, k, 0)),  # pipelined token chunks
                pl.BlockSpec((bm, sc), lambda i, k: (i, k)),        # lane-dense mask chunks
                pl.BlockSpec((D, HP1), lambda i, k: (0, 0)),        # weights: full, un-gridded
                pl.BlockSpec((1, HP1), lambda i, k: (0, 0)),
                pl.BlockSpec((HP1, HP2), lambda i, k: (0, 0)),
                pl.BlockSpec((1, HP2), lambda i, k: (0, 0)),
            ],
            out_specs=pl.BlockSpec((bm, HP2), lambda i, k: (i, 0)),
            scratch_shapes=[
                pltpu.VMEM((bm, D), jnp.float32),   # pooled-sum accumulator
                pltpu.VMEM((bm, 1), jnp.float32),   # valid-token counts
            ],
        ),
        compiler_params=pltpu.CompilerParams(
            dimension_semantics=("parallel", "arbitrary"),
            vmem_limit_bytes=vmem_limit,
        ),
        cost_estimate=cost,
    )(token_embeddings, mask, w1_p, b1_p, w2_p, b2_p)

    return out[:, :H2]


def synthetic_encoder(input_ids, embed_table):
    # Deterministic stand-in for the pretrained BERT encoder: a plain
    # embedding lookup producing token embeddings of shape (B, S, DIM).
    return jnp.take(embed_table, input_ids, axis=0)


if __name__ == "__main__":
    key = jax.random.PRNGKey(0)
    k_emb, k_ids, k_w1, k_b1, k_w2, k_b2 = jax.random.split(key, 6)

    B, S = 2, 8
    VOCAB = 64

    embed_table = jax.random.normal(k_emb, (VOCAB, DIM), dtype=jnp.float32) * 0.02
    input_ids = jax.random.randint(k_ids, (B, S), 0, VOCAB)
    # attention mask: first sequence fully valid, second has last 3 tokens padded
    attention_mask = jnp.array([[1] * S, [1] * (S - 3) + [0] * 3], dtype=jnp.int32)

    # mlp_projection parameters (deterministic init)
    w1 = jax.random.normal(k_w1, (DIM, HIDDEN), dtype=jnp.float32) * 0.02
    b1 = jax.random.normal(k_b1, (HIDDEN,), dtype=jnp.float32) * 0.02
    w2 = jax.random.normal(k_w2, (HIDDEN, HIDDEN), dtype=jnp.float32) * 0.02
    b2 = jax.random.normal(k_b2, (HIDDEN,), dtype=jnp.float32) * 0.02

    token_embeddings = synthetic_encoder(input_ids, embed_table)
    tok_bf16 = token_embeddings.astype(jnp.bfloat16)   # bf16 activations: half HBM traffic

    out = pool_and_project(tok_bf16, attention_mask, w1, b1, w2, b2)
    out = jax.block_until_ready(out)

    # pure-JAX reference with the same bf16 quantization of activations/weights
    tok_f = tok_bf16.astype(jnp.float32)
    mask_f = attention_mask.astype(jnp.float32)[..., None]
    emb_ref = jnp.sum(tok_f * mask_f, axis=1) / jnp.maximum(jnp.sum(mask_f, axis=1), 1e-9)
    w1_q = w1.astype(jnp.bfloat16).astype(jnp.float32)
    w2_q = w2.astype(jnp.bfloat16).astype(jnp.float32)
    emb_q = emb_ref.astype(jnp.bfloat16).astype(jnp.float32)
    h_ref = jnp.maximum(emb_q @ w1_q + b1, 0.0)
    h_q = h_ref.astype(jnp.bfloat16).astype(jnp.float32)
    ref = h_q @ w2_q + b2

    assert out.shape == (B, HIDDEN)
    err = float(jnp.max(jnp.abs(out - ref)))
    assert jnp.allclose(out, ref, atol=3e-4, rtol=3e-3), err

    print("KERNEL_OK")
</pallas_src>

<mosaic_0001>
module attributes {stable_mosaic.version = 11 : i64} {
  func.func @_pool_mlp_kernel(%arg0: i32, %arg1: i32, %arg2: memref<2x8x768xbf16, #tpu.memory_space<vmem>>, %arg3: memref<2x8xf32, #tpu.memory_space<vmem>>, %arg4: memref<768x128xbf16, #tpu.memory_space<vmem>>, %arg5: memref<1x128xf32, #tpu.memory_space<vmem>>, %arg6: memref<128x128xbf16, #tpu.memory_space<vmem>>, %arg7: memref<1x128xf32, #tpu.memory_space<vmem>>, %arg8: memref<2x128xf32, #tpu.memory_space<vmem>>, %arg9: memref<2x768xf32, #tpu.memory_space<vmem>>, %arg10: memref<2x1xf32, #tpu.memory_space<vmem>>) attributes {dimension_semantics = [#tpu.dimension_semantics<parallel>, #tpu.dimension_semantics<arbitrary>], iteration_bounds = array<i64: 1, 1>, scalar_prefetch = 0 : i64, scratch_operands = 2 : i64, tpu.core_type = #tpu.core_type<tc>, window_params = [{transform_indices = @transform_0, window_bounds = array<i64: 2, 8, 768>}, {transform_indices = @transform_1, window_bounds = array<i64: 2, 8>}, {pipeline_mode = #tpu.pipeline_mode<synchronous>, transform_indices = @transform_2, window_bounds = array<i64: 768, 128>}, {pipeline_mode = #tpu.pipeline_mode<synchronous>, transform_indices = @transform_3, window_bounds = array<i64: 1, 128>}, {pipeline_mode = #tpu.pipeline_mode<synchronous>, transform_indices = @transform_4, window_bounds = array<i64: 128, 128>}, {pipeline_mode = #tpu.pipeline_mode<synchronous>, transform_indices = @transform_5, window_bounds = array<i64: 1, 128>}, {transform_indices = @transform_6, window_bounds = array<i64: 2, 128>}]} {
    %c0_i32 = arith.constant 0 : i32
    %0 = arith.cmpi eq, %arg1, %c0_i32 : i32
    %1 = arith.extui %0 : i1 to i32
    %c0_i32_0 = arith.constant 0 : i32
    %2 = arith.cmpi ne, %1, %c0_i32_0 : i32
    scf.if %2 {
      %cst_18 = arith.constant 0.000000e+00 : f32
      %25 = vector.broadcast %cst_18 : f32 to vector<2x768xf32>
      %c0_19 = arith.constant 0 : index
      %c0_20 = arith.constant 0 : index
      %26 = vector.load %arg9[%c0_19, %c0_20] : memref<2x768xf32, #tpu.memory_space<vmem>>, vector<2x768xf32>
      tpu.vector_store %arg9[%c0_19, %c0_20], %25 {strides = array<i32>} : memref<2x768xf32, #tpu.memory_space<vmem>>, vector<2x768xf32>,
      %cst_21 = arith.constant 0.000000e+00 : f32
      %27 = vector.broadcast %cst_21 : f32 to vector<2x1xf32>
      %c0_22 = arith.constant 0 : index
      %c0_23 = arith.constant 0 : index
      %28 = vector.load %arg10[%c0_22, %c0_23] : memref<2x1xf32, #tpu.memory_space<vmem>>, vector<2x1xf32>
      tpu.vector_store %arg10[%c0_22, %c0_23], %27 {strides = array<i32>} : memref<2x1xf32, #tpu.memory_space<vmem>>, vector<2x1xf32>,
    } else {
    }
    %c0 = arith.constant 0 : index
    %c0_1 = arith.constant 0 : index
    %3 = vector.load %arg3[%c0, %c0_1] : memref<2x8xf32, #tpu.memory_space<vmem>>, vector<2x8xf32>
    %c0_2 = arith.constant 0 : index
    %c0_3 = arith.constant 0 : index
    %c0_4 = arith.constant 0 : index
    %4 = vector.load %arg2[%c0_2, %c0_3, %c0_4] : memref<2x8x768xbf16, #tpu.memory_space<vmem>>, vector<2x8x768xbf16>
    %5 = arith.extf %4 : vector<2x8x768xbf16> to vector<2x8x768xf32>
    %6 = vector.shape_cast %3 : vector<2x8xf32> to vector<2x8x1xf32>
    %7 = vector.shape_cast %6 : vector<2x8x1xf32> to vector<2x8x1xf32>
    %8 = vector.broadcast %7 : vector<2x8x1xf32> to vector<2x8x768xf32>
    %cst = arith.constant 0.000000e+00 : f32
    %9 = vector.broadcast %cst : f32 to vector<2x8x768xf32>
    %10 = arith.cmpf ogt, %8, %9 : vector<2x8x768xf32>
    %cst_5 = arith.constant 0.000000e+00 : f32
    %11 = vector.broadcast %cst_5 : f32 to vector<2x8x768xf32>
    %12 = arith.select %10, %5, %11 : vector<2x8x768xi1>, vector<2x8x768xf32>
    %c0_6 = arith.constant 0 : index
    %c0_7 = arith.constant 0 : index
    %13 = vector.load %arg9[%c0_6, %c0_7] : memref<2x768xf32, #tpu.memory_space<vmem>>, vector<2x768xf32>
    %cst_8 = arith.constant dense<0.000000e+00> : vector<2x768xf32>
    %14 = vector.multi_reduction <add>, %12, %cst_8 [1] : vector<2x8x768xf32> to vector<2x768xf32>
    %15 = arith.addf %13, %14 : vector<2x768xf32>
    %c0_9 = arith.constant 0 : index
    %c0_10 = arith.constant 0 : index
    %16 = vector.load %arg9[%c0_9, %c0_10] : memref<2x768xf32, #tpu.memory_space<vmem>>, vector<2x768xf32>
    tpu.vector_store %arg9[%c0_9, %c0_10], %15 {strides = array<i32>} : memref<2x768xf32, #tpu.memory_space<vmem>>, vector<2x768xf32>,
    %c0_11 = arith.constant 0 : index
    %c0_12 = arith.constant 0 : index
    %17 = vector.load %arg10[%c0_11, %c0_12] : memref<2x1xf32, #tpu.memory_space<vmem>>, vector<2x1xf32>
    %cst_13 = arith.constant dense<0.000000e+00> : vector<2xf32>
    %18 = vector.multi_reduction <add>, %3, %cst_13 [1] : vector<2x8xf32> to vector<2xf32>
    %19 = vector.shape_cast %18 : vector<2xf32> to vector<2x1xf32>
    %20 = arith.addf %17, %19 : vector<2x1xf32>
    %c0_14 = arith.constant 0 : index
    %c0_15 = arith.constant 0 : index
    %21 = vector.load %arg10[%c0_14, %c0_15] : memref<2x1xf32, #tpu.memory_space<vmem>>, vector<2x1xf32>
    tpu.vector_store %arg10[%c0_14, %c0_15], %20 {strides = array<i32>} : memref<2x1xf32, #tpu.memory_space<vmem>>, vector<2x1xf32>,
    %c0_i32_16 = arith.constant 0 : i32
    %22 = arith.cmpi eq, %arg1, %c0_i32_16 : i32
    %23 = arith.extui %22 : i1 to i32
    %c0_i32_17 = arith.constant 0 : i32
    %24 = arith.cmpi ne, %23, %c0_i32_17 : i32
    scf.if %24 {
      %c0_18 = arith.constant 0 : index
      %c0_19 = arith.constant 0 : index
      %25 = vector.load %arg10[%c0_18, %c0_19] : memref<2x1xf32, #tpu.memory_space<vmem>>, vector<2x1xf32>
      %cst_20 = arith.constant 9.99999971E-10 : f32
      %26 = vector.broadcast %cst_20 : f32 to vector<2x1xf32>
      %27 = arith.maximumf %25, %26 : vector<2x1xf32>
      %c0_21 = arith.constant 0 : index
      %c0_22 = arith.constant 0 : index
      %28 = vector.load %arg9[%c0_21, %c0_22] : memref<2x768xf32, #tpu.memory_space<vmem>>, vector<2x768xf32>
      %29 = tpu.reciprocal %27 {approx = true} : vector<2x1xf32> -> vector<2x1xf32>
      %30 = vector.broadcast %29 : vector<2x1xf32> to vector<2x768xf32>
      %31 = arith.mulf %28, %30 : vector<2x768xf32>
      %32 = arith.truncf %31 : vector<2x768xf32> to vector<2x768xbf16>
      %c0_23 = arith.constant 0 : index
      %c0_24 = arith.constant 0 : index
      %33 = vector.load %arg4[%c0_23, %c0_24] : memref<768x128xbf16, #tpu.memory_space<vmem>>, vector<768x128xbf16>
      %cst_25 = arith.constant dense<0.000000e+00> : vector<2x128xf32>
      %34 = tpu.matmul %32, %33, %cst_25 {dimension_numbers = #tpu.dot_dimension_numbers<[1], [0], [0], [1], [0, 0, 1, 1], [], []>} : vector<2x768xbf16>, vector<768x128xbf16>, vector<2x128xf32> -> vector<2x128xf32>
      %c0_26 = arith.constant 0 : index
      %c0_27 = arith.constant 0 : index
      %35 = vector.load %arg5[%c0_26, %c0_27] : memref<1x128xf32, #tpu.memory_space<vmem>>, vector<1x128xf32>
      %36 = vector.broadcast %35 : vector<1x128xf32> to vector<2x128xf32>
      %37 = arith.addf %34, %36 : vector<2x128xf32>
      %cst_28 = arith.constant 0.000000e+00 : f32
      %38 = vector.broadcast %cst_28 : f32 to vector<2x128xf32>
      %39 = arith.maximumf %37, %38 : vector<2x128xf32>
      %40 = arith.truncf %39 : vector<2x128xf32> to vector<2x128xbf16>
      %c0_29 = arith.constant 0 : index
      %c0_30 = arith.constant 0 : index
      %41 = vector.load %arg6[%c0_29, %c0_30] : memref<128x128xbf16, #tpu.memory_space<vmem>>, vector<128x128xbf16>
      %cst_31 = arith.constant dense<0.000000e+00> : vector<2x128xf32>
      %42 = tpu.matmul %40, %41, %cst_31 {dimension_numbers = #tpu.dot_dimension_numbers<[1], [0], [0], [1], [0, 0, 1, 1], [], []>} : vector<2x128xbf16>, vector<128x128xbf16>, vector<2x128xf32> -> vector<2x128xf32>
      %c0_32 = arith.constant 0 : index
      %c0_33 = arith.constant 0 : index
      %43 = vector.load %arg7[%c0_32, %c0_33] : memref<1x128xf32, #tpu.memory_space<vmem>>, vector<1x128xf32>
      %44 = vector.broadcast %43 : vector<1x128xf32> to vector<2x128xf32>
      %45 = arith.addf %42, %44 : vector<2x128xf32>
      %c0_34 = arith.constant 0 : index
      %c0_35 = arith.constant 0 : index
      %46 = vector.load %arg8[%c0_34, %c0_35] : memref<2x128xf32, #tpu.memory_space<vmem>>, vector<2x128xf32>
      tpu.vector_store %arg8[%c0_34, %c0_35], %45 {strides = array<i32>} : memref<2x128xf32, #tpu.memory_space<vmem>>, vector<2x128xf32>,
    } else {
    }
    return
  }
  func.func @transform_0(%arg0: i32, %arg1: i32) -> (i32, i32, i32) {
    %c0_i32 = arith.constant 0 : i32
    %c0_i32_0 = arith.constant 0 : i32
    return %arg0, %arg1, %c0_i32 : i32, i32, i32
  }
  func.func @transform_1(%arg0: i32, %arg1: i32) -> (i32, i32) {
    %c0_i32 = arith.constant 0 : i32
    return %arg0, %arg1 : i32, i32
  }
  func.func @transform_2(%arg0: i32, %arg1: i32) -> (i32, i32) {
    %c0_i32 = arith.constant 0 : i32
    %c0_i32_0 = arith.constant 0 : i32
    %c0_i32_1 = arith.constant 0 : i32
    return %c0_i32, %c0_i32_0 : i32, i32
  }
  func.func @transform_3(%arg0: i32, %arg1: i32) -> (i32, i32) {
    %c0_i32 = arith.constant 0 : i32
    %c0_i32_0 = arith.constant 0 : i32
    %c0_i32_1 = arith.constant 0 : i32
    return %c0_i32, %c0_i32_0 : i32, i32
  }
  func.func @transform_4(%arg0: i32, %arg1: i32) -> (i32, i32) {
    %c0_i32 = arith.constant 0 : i32
    %c0_i32_0 = arith.constant 0 : i32
    %c0_i32_1 = arith.constant 0 : i32
    return %c0_i32, %c0_i32_0 : i32, i32
  }
  func.func @transform_5(%arg0: i32, %arg1: i32) -> (i32, i32) {
    %c0_i32 = arith.constant 0 : i32
    %c0_i32_0 = arith.constant 0 : i32
    %c0_i32_1 = arith.constant 0 : i32
    return %c0_i32, %c0_i32_0 : i32, i32
  }
  func.func @transform_6(%arg0: i32, %arg1: i32) -> (i32, i32) {
    %c0_i32 = arith.constant 0 : i32
    %c0_i32_0 = arith.constant 0 : i32
    return %arg0, %c0_i32 : i32, i32
  }
}

</mosaic_0001>

<bundles_post_ra>
// kernel: tpu_custom_call.1
= control target key start
LH: loop header
LB: loop body
LE: loop exit
PB: predicated region body
PF: predicated region fallthrough
CT: control target
= control target key end

     0   :  { %11 = vsyncpa [#allocation5], 0  ;;  %s1412_s0 = inlined_call_operand.hbm [shape: bf16[2,8,768], index: 0, kind: input, shape index: {}]   ;;  %s1413_s1 = inlined_call_operand.hbm [shape: f32[2,8], index: 1, kind: input, shape index: {}]   ;;  %s1414_s2 = inlined_call_operand.hbm [shape: bf16[768,128], index: 2, kind: input, shape index: {}]   ;;  %s1415_s3 = inlined_call_operand.vmem [shape: f32[1,128], index: 3, kind: input, shape index: {}]   ;;  %s1416_s4 = inlined_call_operand.hbm [shape: bf16[128,128], index: 4, kind: input, shape index: {}]   ;;  %s1417_s5 = inlined_call_operand.vmem [shape: f32[1,128], index: 5, kind: input, shape index: {}]   ;;  %s1418_s6 = inlined_call_operand.hbm [shape: f32[2,128], index: 6, kind: output, shape index: {}]  }
   0x1   :  { %12 = vsyncpa [#allocation8], 0 }
   0x2   :  { %13 = vsyncpa [#allocation11], 0  ;;  %s33_s23 = sshll.u32 %s1413_s1, 4  ;;  %s34_s23 = int_to_ptr.hbm [resolvable:$true] %s33_s23 }
   0x3   :  { %14 = vsyncpa [#allocation6], 0  ;;  %s1318_s24 = smov [#allocation7]   ;;  %s19_s28 = sshll.u32 %s1412_s0, 4  ;;  %s20_s28 = int_to_ptr.hbm [resolvable:$true] %s19_s28 }
   0x4   :  { %s35_s25 = sshll.u32 %s1318_s24, 4  ;;  %s1319_s29 = smov [#allocation4]   ;;  %s36_s25 = int_to_ptr.vmem [resolvable:$true] %s35_s25 }
   0x5   :  { %38 = dma.hbm_to_vmem [thread:$0]  %s34_s23, 32, %s36_s25, [#allocation8]  }
   0x6   :  { %s21_s30 = sshll.u32 %s1319_s29, 4  ;;  %s1320_s7 = smov 384   ;;  %s22_s30 = int_to_ptr.vmem [resolvable:$true] %s21_s30 }
   0x7   :  { %s1321_s8 = smov 24   ;;  %s43_s1 = sshll.u32 %s1414_s2, 4  ;;  %s44_s1 = int_to_ptr.hbm [resolvable:$true] %s43_s1 }
   0x8   :  { %27 = dma.hbm_to_vmem [thread:$0]  %s20_s28, 768, %s22_s30, [#allocation5], %s1320_s7, %s1320_s7, %s1321_s8  }
   0x9   :  { %s1322_s11 = smov [#allocation9]   ;;  %s58_s0 = sshll.u32 %s1416_s4, 4  ;;  %s59_s0 = int_to_ptr.hbm [resolvable:$true] %s58_s0 }
   0xa   :  { %s45_s12 = sshll.u32 %s1322_s11, 4  ;;  %s1323_s15 = smov 64   ;;  %s46_s12 = int_to_ptr.vmem [resolvable:$true] %s45_s12 }
   0xb   :  { %s1324_s16 = smov 4   ;;  %s1325_s17 = smov [#allocation10]  }
   0xc   :  { %51 = dma.hbm_to_vmem [thread:$0]  %s44_s1, 6144, %s46_s12, [#allocation8], %s1323_s15, %s1323_s15, %s1324_s16  }
   0xd   :  { %s60_s18 = sshll.u32 %s1325_s17, 4  ;;  %s61_s18 = int_to_ptr.vmem [resolvable:$true] %s60_s18 }
   0xe   :  { %66 = dma.hbm_to_vmem [thread:$0]  %s59_s0, 1024, %s61_s18, [#allocation11], %s1323_s15, %s1323_s15, %s1324_s16  }
   0xf   :  { %1310 = dma.done.wait [#allocation5], 768  }
  0x10   :  { %1311 = vsyncadd [#allocation5], 4294966528 }
  0x11   :  { %1312 = dma.done.wait [#allocation8], 6176  }
  0x12   :  { %1313 = vsyncadd [#allocation8], 4294961120 }
  0x13   :  { %1314 = dma.done.wait [#allocation11], 1024  }
  0x14   :  { %1315 = vsyncadd [#allocation11], 4294966272  ;;  %v113_v0 = vlaneseq  ;;  %vm91_vm0 = vcmask 1024   ;;  %v1326_v1 = vmov 0.0   ;;  %vm272_vm1 = vcmask 58368   ;;  %v94_v11 = vld [vmem:[#allocation4] sm:$0xff] }
  0x15   :  { %90 = vst [vmem:[#allocation2 + $0x8] sm:$0xf] %v1326_v1  ;;  %v93_v3 = vld [vmem:[#allocation7] sm:$0x3]  ;;  %v1327_v7 = vmov 0   ;;  %v95_v12 = vld [vmem:[#allocation4 + $0x8] sm:$0xff]  ;;  %v100_v15 = vunpack.c.l.bf16 %v94_v11  ;;  %v101_v16 = vunpack.c.h.bf16 %v94_v11 }
  0x16   :  { %v114_v2 = vshrl.u32 %v113_v0, 7  ;;  %92 = vst.msk [vmem:[#allocation3] sm:$0x3] %vm91_vm0, %v1326_v1  ;;  %v273_v4 = vsel %vm272_vm1, %v93_v3, 0.0  ;;  %v112_v5 = vperm.slane %v93_v3, 0  ;;  %v119_v6 = vperm.slane %v93_v3, 1 }
  0x17   :  { %274 = vadd.xlane.f32.xlu0 %v273_v4  ;;  %v96_v13 = vld [vmem:[#allocation4 + $0x10] sm:$0xff]  ;;  %v102_v17 = vunpack.c.l.bf16 %v95_v12  ;;  %v103_v18 = vunpack.c.h.bf16 %v95_v12  ;;  %v97_v30 = vld [vmem:[#allocation4 + $0x18] sm:$0xff]  ;;  %v98_v31 = vld [vmem:[#allocation4 + $0x20] sm:$0xff]  ;;  %vm234_vm4 = vcmask 1041408   ;;  %vm236_vm5 = vcmask 1045508   ;;  %s1329_s20 = smov [#allocation12]  }
  0x18   :  { %1182 = vset.pattern.permute.xlu0 %v114_v2  ;;  %1183 = vset.pattern.permute.xlu1 %v114_v2  ;;  %v104_v19 = vunpack.c.l.bf16 %v96_v13  ;;  %v105_v20 = vunpack.c.h.bf16 %v96_v13  ;;  %v106_v36 = vunpack.c.l.bf16 %v97_v30  ;;  %v99_v43 = vld [vmem:[#allocation4 + $0x28] sm:$0xff]  ;;  %v107_v44 = vunpack.c.h.bf16 %v97_v30  ;;  %v1135_v30 = vld [vmem:[#allocation9 + $0xa8] sm:$0xff]  ;;  %s876_s21 = sshll.u32 %s1329_s20, 4  ;;  %s878_s24 = sshll.u32 %s1418_s6, 4  ;;  %s877_s21 = int_to_ptr.vmem [resolvable:$true] %s876_s21  ;;  %s879_s24 = int_to_ptr.hbm [resolvable:$true] %s878_s24 }
  0x19   :  { %v108_v45 = vunpack.c.l.bf16 %v98_v31  ;;  %v1121_v48 = vld [vmem:[#allocation9 + $0x38] sm:$0xff]  ;;  %v109_v54 = vunpack.c.h.bf16 %v98_v31  ;;  %v110_v55 = vunpack.c.l.bf16 %v99_v43  ;;  %v1120_v58 = vld [vmem:[#allocation9 + $0x30] sm:$0xff]  ;;  %v111_v60 = vunpack.c.h.bf16 %v99_v43 }
  0x1a   :  { %v1129_v49 = vld [vmem:[#allocation9 + $0x78] sm:$0xff]  ;;  %709 = vmatpush.bf16.msra.mxu0 %v1121_v48  ;;  %v1128_v59 = vld [vmem:[#allocation9 + $0x70] sm:$0xff]  ;;  %vm238_vm6 = vcmask 1043456   ;;  %vm250_vm7 = vcmask 1041409   ;;  %vm252_vm8 = vcmask 1043459   ;;  %vm254_vm9 = vcmask 1045509  }
  0x1b   :  { %722 = vmatpush.bf16.msra.mxu1 %v1129_v49  ;;  %v1137_v0 = vld [vmem:[#allocation9 + $0xb8] sm:$0xff]  ;;  %vm256_vm10 = vcmask 1047559  }
  0x1c   :  { %v1145_v1 = vld [vmem:[#allocation9 + $0xf8] sm:$0xff]  ;;  %735 = vmatpush.bf16.msra.mxu2 %v1137_v0 }
  0x1d   :  { %v271_v8 = vld [vmem:[#allocation3] sm:$0x3]  ;;  %748 = vmatpush.bf16.msra.mxu3 %v1145_v1 }
  0x1e   :  { %710 = vmatpush.bf16.msra.mxu0 %v1120_v58 }
  0x1f   :  { %723 = vmatpush.bf16.msra.mxu1 %v1128_v59 }
  0x20   :  { %117 = vperm.xlu1 %1183, %v112_v5  }
  0x28   :  { %1184 = vset.pattern.permute.xlu1 %v1327_v7 }
  0x2b   :  { %124 = vperm.xlu0 %1182, %v119_v6  }
  0x33   :  { %1185 = vset.pattern.permute.xlu0 %v1327_v7 }
  0x8a   :  { %v275_v9 = vpop.xlane.xlu0 %274 }
  0x8b   :  { %v276_v10 = vadd.f32 %v275_v9, %v271_v8 }
  0x8d   :  { %278 = vst.msk [vmem:[#allocation3] sm:$0x3] %vm91_vm0, %v276_v10  ;;  %v1136_v10 = vld [vmem:[#allocation9 + $0xb0] sm:$0xff] }
  0x8e   :  { %736 = vmatpush.bf16.msra.mxu2 %v1136_v10 }
  0x92   :  { %v118_v14 = vpop.permute.xlu1 %117  ;;  %737 = vmatpush.bf16.msra.mxu2 %v1135_v30  ;;  %v1123_v30 = vld [vmem:[#allocation9 + $0x48] sm:$0xff] }
  0x93   :  { %vm126_vm2 = vcmp.gt.f32.partialorder %v118_v14, 0.0 }
  0x94   :  { %v282_v21 = vld [vmem:[#allocation3] sm:$0x3]  ;;  %v128_v22 = vsel %vm126_vm2, %v100_v15, 0.0  ;;  %v129_v23 = vsel %vm126_vm2, %v101_v16, 0.0  ;;  %v130_v24 = vsel %vm126_vm2, %v102_v17, 0.0  ;;  %v131_v25 = vsel %vm126_vm2, %v103_v18, 0.0 }
  0x95   :  { %v283_v26 = vmax.f32 %v282_v21, 1e-09  ;;  %v132_v27 = vsel %vm126_vm2, %v104_v19, 0.0  ;;  %v133_v28 = vsel %vm126_vm2, %v105_v20, 0.0  ;;  %v142_v29 = vrot.slane %v128_v22, 4  ;;  %v1119_v15 = vld [vmem:[#allocation9 + $0x28] sm:$0xff] }
  0x96   :  { %v148_v32 = vrot.slane %v129_v23, 4  ;;  %v154_v33 = vrot.slane %v130_v24, 4  ;;  %v160_v34 = vrot.slane %v131_v25, 4  ;;  %v166_v35 = vrot.slane %v132_v27, 4  ;;  %v1127_v20 = vld [vmem:[#allocation9 + $0x68] sm:$0xff]  ;;  %v1144_v21 = vld [vmem:[#allocation9 + $0xf0] sm:$0xff]  ;;  %711 = vmatpush.bf16.msra.mxu0 %v1119_v15 }
  0x97   :  { %1188 = vrcp.f32 %v283_v26  ;;  %v143_v37 = vadd.f32 %v142_v29, %v128_v22  ;;  %v172_v38 = vrot.slane %v133_v28, 4  ;;  %724 = vmatpush.bf16.msra.mxu1 %v1127_v20  ;;  %749 = vmatpush.bf16.msra.mxu3 %v1144_v21  ;;  %v1124_v15 = vld [vmem:[#allocation9 + $0x50] sm:$0xff] }
  0x98   :  { %v149_v39 = vadd.f32 %v148_v32, %v129_v23  ;;  %v155_v40 = vadd.f32 %v154_v33, %v130_v24  ;;  %v161_v41 = vadd.f32 %v160_v34, %v131_v25  ;;  %v167_v42 = vadd.f32 %v166_v35, %v132_v27  ;;  %v1118_v35 = vld [vmem:[#allocation9 + $0x20] sm:$0xff] }
  0x99   :  { %v144_v46 = vrot.slane %v143_v37, 2  ;;  %v173_v47 = vadd.f32 %v172_v38, %v133_v28 }
  0x9a   :  { %v150_v50 = vrot.slane %v149_v39, 2  ;;  %v156_v51 = vrot.slane %v155_v40, 2  ;;  %v162_v52 = vrot.slane %v161_v41, 2  ;;  %v168_v53 = vrot.slane %v167_v42, 2  ;;  %712 = vmatpush.bf16.msra.mxu0 %v1118_v35 }
  0x9b   :  { %v145_v56 = vadd.f32 %v144_v46, %v143_v37  ;;  %v174_v57 = vrot.slane %v173_v47, 2 }
  0x9c   :  { %v151_v61 = vadd.f32 %v150_v50, %v149_v39  ;;  %v157_v62 = vadd.f32 %v156_v51, %v155_v40  ;;  %v163_v63 = vadd.f32 %v162_v52, %v161_v41  ;;  %v1379_v5 = vadd.f32 %v168_v53, %v167_v42  ;;  %v1126_v40 = vld [vmem:[#allocation9 + $0x60] sm:$0xff]  ;;  %v1143_v41 = vld [vmem:[#allocation9 + $0xe8] sm:$0xff] }
  0x9d   :  { %v1189_v2 = vpop.eup %1188  ;;  %v125_v3 = vpop.permute.xlu0 %124  ;;  %v146_v4 = vrot.slane %v145_v56, 1  ;;  %v1381_v6 = vadd.f32 %v174_v57, %v173_v47  ;;  %v1134_v50 = vld [vmem:[#allocation9 + $0xa0] sm:$0xff]  ;;  %725 = vmatpush.bf16.msra.mxu1 %v1126_v40  ;;  %750 = vmatpush.bf16.msra.mxu3 %v1143_v41  ;;  %v1153_v40 = vld [vmem:[#allocation9 + $0x138] sm:$0xff] }
  0x9e   :  { %289 = vperm.xlu1 %1184, %v1189_v2   ;;  %vm127_vm3 = vcmp.gt.f32.partialorder %v125_v3, 0.0  ;;  %v152_v7 = vrot.slane %v151_v61, 1  ;;  %v158_v8 = vrot.slane %v157_v62, 1  ;;  %v164_v9 = vrot.slane %v163_v63, 1  ;;  %738 = vmatpush.bf16.msra.mxu2 %v1134_v50  ;;  %v1131_v50 = vld [vmem:[#allocation9 + $0x88] sm:$0xff] }
  0x9f   :  { %v134_v11 = vsel %vm127_vm3, %v106_v36, 0.0  ;;  %v135_v12 = vsel %vm127_vm3, %v107_v44, 0.0  ;;  %v136_v13 = vsel %vm127_vm3, %v108_v45, 0.0  ;;  %v137_v14 = vsel %vm127_vm3, %v109_v54, 0.0 }
  0xa0   :  { %v138_v16 = vsel %vm127_vm3, %v110_v55, 0.0  ;;  %v139_v17 = vsel %vm127_vm3, %v111_v60, 0.0  ;;  %v178_v18 = vrot.slane %v134_v11, 4  ;;  %v184_v19 = vrot.slane %v135_v12, 4  ;;  %v1117_v55 = vld [vmem:[#allocation9 + $0x18] sm:$0xff] }
  0xa1   :  { %v190_v22 = vrot.slane %v136_v13, 4  ;;  %v196_v23 = vrot.slane %v137_v14, 4  ;;  %v202_v24 = vrot.slane %v138_v16, 4  ;;  %v208_v25 = vrot.slane %v139_v17, 4  ;;  %v1125_v60 = vld [vmem:[#allocation9 + $0x58] sm:$0xff]  ;;  %713 = vmatpush.bf16.msra.mxu0 %v1117_v55  ;;  %v1138_v55 = vld [vmem:[#allocation9 + $0xc0] sm:$0xff] }
  0xa2   :  { %v179_v26 = vadd.f32 %v178_v18, %v134_v11  ;;  %v185_v27 = vadd.f32 %v184_v19, %v135_v12  ;;  %v1383_v28 = vadd.f32 %v146_v4, %v145_v56  ;;  %v1385_v29 = vadd.f32 %v152_v7, %v151_v61  ;;  %v1142_v61 = vld [vmem:[#allocation9 + $0xe0] sm:$0xff]  ;;  %726 = vmatpush.bf16.msra.mxu1 %v1125_v60  ;;  %v1148_v60 = vld [vmem:[#allocation9 + $0x110] sm:$0xff] }
  0xa3   :  { %v191_v31 = vadd.f32 %v190_v22, %v136_v13  ;;  %v197_v32 = vadd.f32 %v196_v23, %v137_v14  ;;  %v203_v33 = vadd.f32 %v202_v24, %v138_v16  ;;  %v209_v34 = vadd.f32 %v208_v25, %v139_v17  ;;  %751 = vmatpush.bf16.msra.mxu3 %v1142_v61  ;;  %v1141_v16 = vld [vmem:[#allocation9 + $0xd8] sm:$0xff]  ;;  %v1156_v61 = vld [vmem:[#allocation9 + $0x150] sm:$0xff] }
  0xa4   :  { %v180_v36 = vrot.slane %v179_v26, 2  ;;  %v186_v37 = vrot.slane %v185_v27, 2  ;;  %v159_v38 = vadd.f32 %v158_v8, %v157_v62  ;;  %v165_v39 = vadd.f32 %v164_v9, %v163_v63  ;;  %v1133_v8 = vld [vmem:[#allocation9 + $0x98] sm:$0xff] }
  0xa5   :  { %v192_v42 = vrot.slane %v191_v31, 2  ;;  %v198_v43 = vrot.slane %v197_v32, 2  ;;  %v204_v44 = vrot.slane %v203_v33, 2  ;;  %v210_v45 = vrot.slane %v209_v34, 2  ;;  %739 = vmatpush.bf16.msra.mxu2 %v1133_v8 }
  0xa6   :  { %v181_v46 = vadd.f32 %v180_v36, %v179_v26  ;;  %v187_v47 = vadd.f32 %v186_v37, %v185_v27  ;;  %v170_v48 = vrot.slane %v1379_v5, 1  ;;  %v176_v49 = vrot.slane %v1381_v6, 1  ;;  %v1115_v26 = vld [vmem:[#allocation9 + $0x8] sm:$0xff]  ;;  %727 = vmatpush.bf16.msra.mxu1 %v1124_v15  ;;  %v1114_v36 = vld [vmem:[#allocation9] sm:$0xff] }
  0xa7   :  { %v193_v51 = vadd.f32 %v192_v42, %v191_v31  ;;  %v199_v52 = vadd.f32 %v198_v43, %v197_v32  ;;  %v205_v53 = vadd.f32 %v204_v44, %v203_v33  ;;  %v211_v54 = vadd.f32 %v210_v45, %v209_v34  ;;  %752 = vmatpush.bf16.msra.mxu3 %v1141_v16  ;;  %v141_v33 = vld [vmem:[#allocation2 + $0x8] sm:$0xf]  ;;  %v1161_v43 = vld [vmem:[#allocation9 + $0x178] sm:$0xff] }
  0xa8   :  { %v182_v56 = vrot.slane %v181_v46, 1  ;;  %v188_v57 = vrot.slane %v187_v47, 1  ;;  %v171_v58 = vadd.f32 %v170_v48, %v1379_v5  ;;  %v177_v59 = vadd.f32 %v176_v49, %v1381_v6  ;;  %v1116_v6 = vld [vmem:[#allocation9 + $0x10] sm:$0xff] }
  0xa9   :  { %v194_v62 = vrot.slane %v193_v51, 1  ;;  %v200_v63 = vrot.slane %v199_v52, 1  ;;  %v206_v0 = vrot.slane %v205_v53, 1  ;;  %v212_v1 = vrot.slane %v211_v54, 1  ;;  %714 = vmatpush.bf16.msra.mxu0 %v1116_v6  ;;  %v1152_v48 = vld [vmem:[#allocation9 + $0x130] sm:$0xff] }
  0xaa   :  { %v183_v2 = vadd.f32 %v182_v56, %v181_v46  ;;  %v189_v3 = vadd.f32 %v188_v57, %v187_v47  ;;  %v226_v4 = vrot.slane %v1385_v29, 6  ;;  %v227_v7 = vrot.slane %v159_v38, 4  ;;  %728 = vmatpush.bf16.msra.mxu1 %v1123_v30  ;;  %v1132_v46 = vld [vmem:[#allocation9 + $0x90] sm:$0xff]  ;;  %v1150_v56 = vld [vmem:[#allocation9 + $0x120] sm:$0xff] }
  0xab   :  { %v195_v9 = vadd.f32 %v194_v62, %v193_v51  ;;  %v201_v10 = vadd.f32 %v200_v63, %v199_v52  ;;  %v207_v5 = vadd.f32 %v206_v0, %v205_v53  ;;  %v213_v11 = vadd.f32 %v212_v1, %v211_v54  ;;  %v1140_v47 = vld [vmem:[#allocation9 + $0xd0] sm:$0xff]  ;;  %740 = vmatpush.bf16.msra.mxu2 %v1132_v46  ;;  %v1139_v51 = vld [vmem:[#allocation9 + $0xc8] sm:$0xff]  ;;  %v1130_v54 = vld [vmem:[#allocation9 + $0x80] sm:$0xff] }
  0xac   :  { %v230_v12 = vrot.slane %v189_v3, 6  ;;  %v228_v13 = vrot.slane %v165_v39, 2  ;;  %v229_v14 = vrot.slane %v177_v59, 6  ;;  %v235_v20 = vsel %vm234_vm4, %v1383_v28, %v226_v4  ;;  %v1122_v39 = vld [vmem:[#allocation9 + $0x40] sm:$0xff]  ;;  %v1160_v49 = vld [vmem:[#allocation9 + $0x170] sm:$0xff]  ;;  %753 = vmatpush.bf16.msra.mxu3 %v1140_v47  ;;  %v1151_v52 = vld [vmem:[#allocation9 + $0x128] sm:$0xff] }
  0xad   :  { %v231_v17 = vrot.slane %v195_v9, 4  ;;  %v232_v18 = vrot.slane %v201_v10, 2  ;;  %v233_v19 = vrot.slane %v213_v11, 6  ;;  %715 = vmatpush.bf16.msra.mxu0 %v1115_v26  ;;  %v1159_v53 = vld [vmem:[#allocation9 + $0x168] sm:$0xff]  ;;  %v1158_v57 = vld [vmem:[#allocation9 + $0x160] sm:$0xff]  ;;  %v1157_v59 = vld [vmem:[#allocation9 + $0x158] sm:$0xff] }
  0xae   :  { %v241_v21 = vsel %vm234_vm4, %v183_v2, %v230_v12  ;;  %v237_v22 = vsel %vm236_vm5, %v227_v7, %v228_v13  ;;  %v240_v25 = vsel %vm234_vm4, %v171_v58, %v229_v14  ;;  %729 = vmatpush.bf16.msra.mxu1 %v1122_v39  ;;  %v1149_v58 = vld [vmem:[#allocation9 + $0x118] sm:$0xff]  ;;  %v1147_v62 = vld [vmem:[#allocation9 + $0x108] sm:$0xff]  ;;  %v1328_v0 = vmov 269488144   ;;  %v1146_v2 = vld [vmem:[#allocation9 + $0x100] sm:$0xff] }
  0xaf   :  { %v242_v23 = vsel %vm236_vm5, %v231_v17, %v232_v18  ;;  %v244_v24 = vsel %vm234_vm4, %v207_v5, %v233_v19  ;;  %v239_v28 = vsel %vm238_vm6, %v235_v20, %v237_v22  ;;  %741 = vmatpush.bf16.msra.mxu2 %v1131_v50  ;;  %v1155_v63 = vld [vmem:[#allocation9 + $0x148] sm:$0xff]  ;;  %v292_v1 = vunpack.c.l.s4 %v1328_v0  ;;  %v1154_v3 = vld [vmem:[#allocation9 + $0x140] sm:$0xff]  ;;  %v1169_v7 = vld [vmem:[#allocation10 + $0x38] sm:$0xff] }
  0xb0   :  { %v243_v27 = vsel %vm238_vm6, %v241_v21, %v242_v23  ;;  %v260_v29 = vrot.slane %v244_v24, 7  ;;  %754 = vmatpush.bf16.msra.mxu3 %v1139_v51  ;;  %v1168_v10 = vld [vmem:[#allocation10 + $0x30] sm:$0xff]  ;;  %v1167_v24 = vld [vmem:[#allocation10 + $0x28] sm:$0xff]  ;;  %v1165_v26 = vld [vmem:[#allocation10 + $0x18] sm:$0xff] }
  0xb1   :  { %v249_v31 = vrot.slane %v243_v27, 7  ;;  %716 = vmatpush.bf16.msra.mxu0 %v1114_v36  ;;  %v293_v4 = vunpack.c.0.s8 %v292_v1  ;;  %v1164_v27 = vld [vmem:[#allocation10 + $0x10] sm:$0xff]  ;;  %v1187_v51 = vld [vmem:[%s1417_s5] ss:$0 sm:$0xff] }
  0xb2   :  { %v261_v32 = vsel %vm250_vm7, %v260_v29, %v240_v25  ;;  %774 = vmatpush.bf16.msrb.mxu1 %v1161_v43  ;;  %v1166_v25 = vld [vmem:[#allocation10 + $0x20] sm:$0xff] }
  0xb3   :  { %v251_v34 = vsel %vm250_vm7, %v249_v31, %v239_v28  ;;  %v262_v35 = vsel %vm252_vm8, %v260_v29, %v261_v32  ;;  %742 = vmatpush.bf16.msra.mxu2 %v1130_v54  ;;  %v1162_v28 = vld [vmem:[#allocation10] sm:$0xff]  ;;  %v1186_v32 = vld [vmem:[%s1415_s3] ss:$0 sm:$0xff] }
  0xb4   :  { %v253_v37 = vsel %vm252_vm8, %v249_v31, %v251_v34  ;;  %v263_v38 = vsel %vm254_vm9, %v260_v29, %v262_v35  ;;  %755 = vmatpush.bf16.msra.mxu3 %v1138_v55 }
  0xb5   :  { %v255_v41 = vsel %vm254_vm9, %v249_v31, %v253_v37  ;;  %v264_v42 = vsel %vm256_vm10, %v260_v29, %v263_v38  ;;  %761 = vmatpush.bf16.msrb.mxu0 %v1153_v40  ;;  %v1163_v29 = vld [vmem:[#allocation10 + $0x8] sm:$0xff] }
  0xb6   :  { %v257_v44 = vsel %vm256_vm10, %v249_v31, %v255_v41  ;;  %v268_v45 = vadd.f32 %v264_v42, %v141_v33  ;;  %775 = vmatpush.bf16.msrb.mxu1 %v1160_v49 }
  0xb7   :  { %857 = vmatpush.bf16.msrb.mxu2 %v1169_v7 }
  0xb8   :  { %270 = vst [vmem:[#allocation2 + $0x8] sm:$0xf] %v268_v45 }
  0xb9   :  { %762 = vmatpush.bf16.msrb.mxu0 %v1152_v48 }
  0xba   :  { %776 = vmatpush.bf16.msrb.mxu1 %v1159_v53 }
  0xbb   :  { %858 = vmatpush.bf16.msrb.mxu2 %v1168_v10 }
  0xbd   :  { %763 = vmatpush.bf16.msrb.mxu0 %v1151_v52 }
  0xbe   :  { %777 = vmatpush.bf16.msrb.mxu1 %v1158_v57 }
  0xbf   :  { %v285_v5 = vld [vmem:[#allocation2 + $0x8] sm:$0xf]  ;;  %859 = vmatpush.bf16.msrb.mxu2 %v1167_v24 }
  0xc1   :  { %764 = vmatpush.bf16.msrb.mxu0 %v1150_v56 }
  0xc2   :  { %778 = vmatpush.bf16.msrb.mxu1 %v1157_v59 }
  0xc3   :  { %860 = vmatpush.bf16.msrb.mxu2 %v1166_v25 }
  0xc5   :  { %765 = vmatpush.bf16.msrb.mxu0 %v1149_v58 }
  0xc6   :  { %779 = vmatpush.bf16.msrb.mxu1 %v1156_v61 }
  0xc7   :  { %861 = vmatpush.bf16.msrb.mxu2 %v1165_v26 }
  0xc9   :  { %766 = vmatpush.bf16.msrb.mxu0 %v1148_v60 }
  0xca   :  { %780 = vmatpush.bf16.msrb.mxu1 %v1155_v63 }
  0xcb   :  { %862 = vmatpush.bf16.msrb.mxu2 %v1164_v27 }
  0xcd   :  { %767 = vmatpush.bf16.msrb.mxu0 %v1147_v62 }
  0xce   :  { %781 = vmatpush.bf16.msrb.mxu1 %v1154_v3 }
  0xcf   :  { %863 = vmatpush.bf16.msrb.mxu2 %v1163_v29 }
  0xd1   :  { %768 = vmatpush.bf16.msrb.mxu0 %v1146_v2 }
  0xd3   :  { %864 = vmatpush.bf16.msrb.mxu2 %v1162_v28 }
 0x110   :  { %v290_v8 = vpop.permute.xlu1 %289 }
 0x111   :  { %v294_v9 = vperm.slane %v290_v8, %v293_v4 }
 0x113   :  { %v296_v11 = vmul.f32 %v294_v9, %v257_v44  ;;  %v297_v6 = vmul.f32 %v294_v9, %v285_v5 }
 0x115   :  { %300 = vst [vmem:[#allocation1] ss:$4 sm:$0xff] %v296_v11 }
 0x116   :  { %302 = vst [vmem:[#allocation1 + $0x20] ss:$4 sm:$0xff] %v297_v6 }
 0x11c   :  { %v303_v12 = vld.sshfl [vmem:[#allocation1] sm:$0xff pattern:$0x73625140]  ;;  %v304_v13 = vld.sshfl [vmem:[#allocation1 + $0x8] sm:$0xff pattern:$0x73625140] }
 0x11d   :  { %v315_v14 = vpack.c.bf16 %v303_v12, %v303_v12  ;;  %v316_v15 = vpack.c.bf16 %v304_v13, %v304_v13  ;;  %v305_v16 = vld.sshfl [vmem:[#allocation1 + $0x10] sm:$0xff pattern:$0x73625140]  ;;  %v306_v17 = vld.sshfl [vmem:[#allocation1 + $0x18] sm:$0xff pattern:$0x73625140] }
 0x11e   :  { %v317_v18 = vpack.c.bf16 %v305_v16, %v305_v16  ;;  %v318_v19 = vpack.c.bf16 %v306_v17, %v306_v17  ;;  %v307_v20 = vld.sshfl [vmem:[#allocation1 + $0x20] sm:$0xff pattern:$0x73625140]  ;;  %v308_v21 = vld.sshfl [vmem:[#allocation1 + $0x28] sm:$0xff pattern:$0x73625140] }
 0x11f   :  { %717 = vmatmul.bf16.vlgmr.msra.gmra.mxu0 %v315_v14  ;;  %730 = vmatmul.bf16.vlgmr.msra.gmra.mxu1 %v316_v15  ;;  %v319_v22 = vpack.c.bf16 %v307_v20, %v307_v20  ;;  %v320_v23 = vpack.c.bf16 %v308_v21, %v308_v21 }
 0x120   :  { %743 = vmatmul.bf16.vlgmr.msra.gmra.mxu2 %v317_v18  ;;  %756 = vmatmul.bf16.vlgmr.msra.gmra.mxu3 %v318_v19 }
 0x12f   :  { %769 = vmatmul.bf16.vlgmr.msrb.gmra.mxu0 %v319_v22  ;;  %782 = vmatmul.bf16.vlgmr.msrb.gmra.mxu1 %v320_v23 }
 0x19c   :  { %v718_v30 = vpop.f32.mrf.mxu0  ;;  %v731_v31 = vpop.f32.mrf.mxu1 }
 0x19d   :  { %v719_v33 = vadd.f32 %v1186_v32, %v718_v30 }
 0x19f   :  { %v732_v38 = vadd.f32 %v731_v31, %v719_v33 }
 0x1a3   :  { %v744_v34 = vpop.f32.mrf.mxu2  ;;  %v757_v35 = vpop.f32.mrf.mxu3 }
 0x1a4   :  { %v720_v36 = vpop.f32.mrf.mxu0  ;;  %v733_v37 = vpop.f32.mrf.mxu1  ;;  %v745_v39 = vadd.f32 %v744_v34, %v732_v38 }
 0x1a6   :  { %v758_v40 = vadd.f32 %v757_v35, %v745_v39 }
 0x1ab   :  { %v746_v41 = vpop.f32.mrf.mxu2  ;;  %v759_v42 = vpop.f32.mrf.mxu3 }
 0x1ac   :  { %v770_v43 = vpop.f32.mrf.mxu0  ;;  %v783_v44 = vpop.f32.mrf.mxu1 }
 0x1ad   :  { %v771_v45 = vadd.f32 %v770_v43, %v758_v40 }
 0x1af   :  { %v784_v46 = vadd.f32 %v783_v44, %v771_v45 }
 0x1b1   :  { %v787_v47 = vmax.f32 %v784_v46, 0.0 }
 0x1b3   :  { %v788_v48 = vpack.c.bf16 %v787_v47, %v787_v47 }
 0x1b4   :  { %v772_v49 = vpop.f32.mrf.mxu0  ;;  %v785_v50 = vpop.f32.mrf.mxu1 }
 0x1b5   :  { %865 = vmatmul.bf16.vlgmr.msrb.gmra.mxu2 %v788_v48 }
 0x238   :  { %v866_v52 = vpop.f32.mrf.mxu2 }
 0x239   :  { %v867_v53 = vadd.f32 %v1187_v51, %v866_v52 }
 0x23b   :  { %870 = vst [vmem:[#allocation12] sm:$0x3] %v867_v53 }
 0x23c   :  { %881 = dma.vmem_to_hbm [thread:$0]  %s877_s21, 32, %s879_s24, [#allocation6]  }
 0x240   :  { %v868_v54 = vpop.f32.mrf.mxu2 }
 0x241   :  { %1316 = dma.done.wait [#allocation6], 32  }
 0x242   :  { %1317 = vsyncadd [#allocation6], 4294967264 }
 0x243   :  { %886 = vsyncpa [#allocation5], 1 }
 0x244   :  { %887 = vsyncpa [#allocation8], 1 }
 0x245   :  { %888 = vsyncpa [#allocation11], 1 }
 0x246   :  { %889 = vsyncpa [#allocation6], 1 }

</bundles_post_ra>
